<compile_context>
chip_gen: v6e
topology: v6e:2x2x1
jax: 0.10.0
libtpu: 0.0.40
codegen_flags: <defaults>
</compile_context>

<pallas_src>
import jax
import jax.numpy as jnp
from jax.experimental import pallas as pl
from jax.experimental.pallas import tpu as pltpu


def _model5_kernel(idx_ref, x1_ref, x2_ref, a1_ref, o_ref):
    # idx_ref: scalar-prefetch (SMEM); only consumed by the index_maps.
    # x1/x2/a1_ref: (TB, F) f32 blocks = the selected S-slice, lane-dense on F.
    # o_ref: (TB, 1)
    del idx_ref
    x1 = x1_ref[...]
    x2 = x2_ref[...]
    a1 = a1_ref[...]
    r1 = jnp.maximum(x1 - 1.0, 0.0) * a1          # relu(input1 - 1) * a1
    r2 = jnp.maximum(x2, 0.0) * a1                # relu(input2) * a1
    y = jnp.maximum(r1 - r2, 0.0)                 # relu(r1 - r2)
    # Feature (lane-axis) reduction on the XLU.  Output lane-width 1 is fine:
    # output bytes are negligible vs. the input reads.
    o_ref[...] = jnp.sum(y, axis=-1, keepdims=True).astype(o_ref.dtype)


def _pick_block_b(batch, feat):
    # 3 inputs x 2 pipeline buffers x (TB, F) f32 tiles must fit scoped VMEM
    # with headroom: a 12 MiB budget clears v5e's 16 MiB default scoped limit
    # and v7x's smaller VMEM (64 MiB physical / 32 MiB scoped default).
    budget = 12 * 1024 * 1024
    tb = budget // (3 * 2 * feat * 4)
    if tb >= batch:
        return batch
    return max(8, (tb // 8) * 8)


def _call_kernel(x1, x2, a1, idx, feat, sel_x, sel_a, out_dtype):
    """x1/x2: (B, *) arrays whose last dim holds `feat`-wide slices; a1 likewise.

    sel_x / sel_a: whether the scalar-prefetched slice index selects the lane
    block (True) or the array is already the pre-selected (B, feat) slice."""
    batch = x1.shape[0]
    tb = _pick_block_b(batch, feat)
    grid = (pl.cdiv(batch, tb),)

    def xmap(i, idx_ref):
        return (i, idx_ref[0]) if sel_x else (i, 0)

    def amap(i, idx_ref):
        return (i, idx_ref[0]) if sel_a else (i, 0)

    x_spec = pl.BlockSpec((tb, feat), xmap)
    a_spec = pl.BlockSpec((tb, feat), amap)
    out_spec = pl.BlockSpec((tb, 1), lambda i, idx_ref: (i, 0))

    return pl.pallas_call(
        _model5_kernel,
        out_shape=jax.ShapeDtypeStruct((batch, 1), out_dtype),
        grid_spec=pltpu.PrefetchScalarGridSpec(
            num_scalar_prefetch=1,
            grid=grid,
            in_specs=[x_spec, x_spec, a_spec],
            out_specs=out_spec,
        ),
        compiler_params=pltpu.CompilerParams(
            # Batch tiles are independent -> shard across both TCs on v7x.
            dimension_semantics=("parallel",),
        ),
    )(idx, x1, x2, a1)


def basic_model5_multi_args(input1, input2, additional_input1,
                            additional_input2=0):
    """input1/input2: (B, S, F) f32; additional_input1 broadcastable to them;
    additional_input2: index along axis 1 (may be negative).  Returns (B, 1)."""
    B, S, F = input1.shape
    dtype = input1.dtype

    # Normalize a possibly-negative slice index (PyTorch semantics).
    idx = jnp.asarray(additional_input2, jnp.int32)
    idx = jnp.where(idx < 0, idx + S, idx).reshape(1)

    a1 = jnp.asarray(additional_input1, dtype)
    a1_is_full = (a1.shape == input1.shape)

    if F % 128 == 0 or S == 1:
        # Lane-aligned feature width (or trivially single slice): select the
        # S-slice with the block DMA itself (scalar-prefetched block index over
        # the flattened last dim), so only B*F elements per input are ever read
        # from HBM and no wrapper-side copy is made.
        x1f = input1.reshape(B, S * F)
        x2f = input2.reshape(B, S * F)
        if a1_is_full:
            a1f = a1.reshape(B, S * F)
            return _call_kernel(x1f, x2f, a1f, idx, F, True, True, dtype)
        # a1 broadcasts (scalar / per-feature / ...): hand the kernel only its
        # selected (B, F) slice; its index_map then ignores the prefetch index.
        a1s = jax.lax.dynamic_index_in_dim(
            jnp.broadcast_to(a1, (B, S, F)), idx[0], 1, keepdims=False)
        return _call_kernel(x1f, x2f, a1s, idx, F, True, False, dtype)

    # Lane-unaligned F (e.g. captum's F=3) with S > 1: a (TB, F) block over
    # (B, S*F) would violate the lane-tiling rule, so pre-select the slice with
    # a cheap XLA slice (still only B*F elements into the kernel) and run the
    # same kernel with the full last dim.
    x1s = jax.lax.dynamic_index_in_dim(input1, idx[0], 1, keepdims=False)
    x2s = jax.lax.dynamic_index_in_dim(input2, idx[0], 1, keepdims=False)
    a1s = jax.lax.dynamic_index_in_dim(
        jnp.broadcast_to(a1, (B, S, F)), idx[0], 1, keepdims=False)
    return _call_kernel(x1s, x2s, a1s, idx, F, False, False, dtype)


def _ref_forward(x1, x2, a1, idx):
    a1 = jnp.broadcast_to(jnp.asarray(a1, x1.dtype), x1.shape)
    r1 = jax.nn.relu(x1 - 1.0) * a1
    r2 = jax.nn.relu(x2) * a1
    return jnp.sum(jax.nn.relu(r1 - r2)[:, idx], axis=-1, keepdims=True)


if __name__ == "__main__":
    key = jax.random.PRNGKey(0)
    k1, k2, k3 = jax.random.split(key, 3)

    # Lane-aligned case: (B, S, F) = (16, 4, 128), select slice idx=2.
    B, S, F = 16, 4, 128
    input1 = jax.random.normal(k1, (B, S, F), dtype=jnp.float32)
    input2 = jax.random.normal(k2, (B, S, F), dtype=jnp.float32)
    add1 = jax.random.normal(k3, (B, S, F), dtype=jnp.float32)
    add2 = 2

    out = jax.block_until_ready(basic_model5_multi_args(input1, input2, add1, add2))
    ref = _ref_forward(input1, input2, add1, add2)
    assert out.shape == (B, 1)
    assert jnp.allclose(out, ref, atol=1e-5, rtol=1e-5)

    # Lane-unaligned case (captum-style F=3) exercises the wrapper-slice path,
    # and a negative index exercises index normalization.
    B2, S2, F2 = 8, 5, 3
    i1 = jax.random.normal(jax.random.PRNGKey(1), (B2, S2, F2), dtype=jnp.float32)
    i2 = jax.random.normal(jax.random.PRNGKey(2), (B2, S2, F2), dtype=jnp.float32)
    a1 = jax.random.normal(jax.random.PRNGKey(3), (B2, S2, F2), dtype=jnp.float32)
    out2 = jax.block_until_ready(basic_model5_multi_args(i1, i2, a1, -1))
    ref2 = _ref_forward(i1, i2, a1, S2 - 1)
    assert out2.shape == (B2, 1)
    assert jnp.allclose(out2, ref2, atol=1e-5, rtol=1e-5)

    # Broadcast additional_input1 (scalar) on the lane-aligned path.
    out3 = jax.block_until_ready(basic_model5_multi_args(input1, input2, 0.5, 1))
    ref3 = _ref_forward(input1, input2, 0.5, 1)
    assert out3.shape == (B, 1)
    assert jnp.allclose(out3, ref3, atol=1e-5, rtol=1e-5)

    print("KERNEL_OK")
</pallas_src>

<mosaic_0001>
module attributes {stable_mosaic.version = 11 : i64} {
  func.func @_model5_kernel(%arg0: i32, %arg1: memref<1xi32, #tpu.memory_space<smem>>, %arg2: memref<16x128xf32, #tpu.memory_space<vmem>>, %arg3: memref<16x128xf32, #tpu.memory_space<vmem>>, %arg4: memref<16x128xf32, #tpu.memory_space<vmem>>, %arg5: memref<16x1xf32, #tpu.memory_space<vmem>>) attributes {dimension_semantics = [#tpu.dimension_semantics<parallel>], iteration_bounds = array<i64: 1>, scalar_prefetch = 1 : i64, scratch_operands = 0 : i64, tpu.core_type = #tpu.core_type<tc>, window_params = [{transform_indices = @transform_0, window_bounds = array<i64: 16, 128>}, {transform_indices = @transform_1, window_bounds = array<i64: 16, 128>}, {transform_indices = @transform_2, window_bounds = array<i64: 16, 128>}, {transform_indices = @transform_3, window_bounds = array<i64: 16, 1>}]} {
    %c0 = arith.constant 0 : index
    %c0_0 = arith.constant 0 : index
    %0 = vector.load %arg2[%c0, %c0_0] : memref<16x128xf32, #tpu.memory_space<vmem>>, vector<16x128xf32>
    %c0_1 = arith.constant 0 : index
    %c0_2 = arith.constant 0 : index
    %1 = vector.load %arg3[%c0_1, %c0_2] : memref<16x128xf32, #tpu.memory_space<vmem>>, vector<16x128xf32>
    %c0_3 = arith.constant 0 : index
    %c0_4 = arith.constant 0 : index
    %2 = vector.load %arg4[%c0_3, %c0_4] : memref<16x128xf32, #tpu.memory_space<vmem>>, vector<16x128xf32>
    %cst = arith.constant 1.000000e+00 : f32
    %3 = vector.broadcast %cst : f32 to vector<16x128xf32>
    %4 = arith.subf %0, %3 : vector<16x128xf32>
    %cst_5 = arith.constant 0.000000e+00 : f32
    %5 = vector.broadcast %cst_5 : f32 to vector<16x128xf32>
    %6 = arith.maximumf %4, %5 : vector<16x128xf32>
    %7 = arith.mulf %6, %2 : vector<16x128xf32>
    %cst_6 = arith.constant 0.000000e+00 : f32
    %8 = vector.broadcast %cst_6 : f32 to vector<16x128xf32>
    %9 = arith.maximumf %1, %8 : vector<16x128xf32>
    %10 = arith.mulf %9, %2 : vector<16x128xf32>
    %11 = arith.subf %7, %10 : vector<16x128xf32>
    %cst_7 = arith.constant 0.000000e+00 : f32
    %12 = vector.broadcast %cst_7 : f32 to vector<16x128xf32>
    %13 = arith.maximumf %11, %12 : vector<16x128xf32>
    %cst_8 = arith.constant dense<0.000000e+00> : vector<16xf32>
    %14 = vector.multi_reduction <add>, %13, %cst_8 [1] : vector<16x128xf32> to vector<16xf32>
    %15 = vector.shape_cast %14 : vector<16xf32> to vector<16x1xf32>
    %c0_9 = arith.constant 0 : index
    %c0_10 = arith.constant 0 : index
    %16 = vector.load %arg5[%c0_9, %c0_10] : memref<16x1xf32, #tpu.memory_space<vmem>>, vector<16x1xf32>
    tpu.vector_store %arg5[%c0_9, %c0_10], %15 {strides = array<i32>} : memref<16x1xf32, #tpu.memory_space<vmem>>, vector<16x1xf32>,
    return
  }
  func.func @transform_0(%arg0: i32, %arg1: memref<1xi32, #tpu.memory_space<smem>>) -> (i32, i32) {
    %c0 = arith.constant 0 : index
    %0 = memref.load %arg1[%c0] : memref<1xi32, #tpu.memory_space<smem>>
    %c0_i32 = arith.constant 0 : i32
    return %arg0, %0 : i32, i32
  }
  func.func @transform_1(%arg0: i32, %arg1: memref<1xi32, #tpu.memory_space<smem>>) -> (i32, i32) {
    %c0 = arith.constant 0 : index
    %0 = memref.load %arg1[%c0] : memref<1xi32, #tpu.memory_space<smem>>
    %c0_i32 = arith.constant 0 : i32
    return %arg0, %0 : i32, i32
  }
  func.func @transform_2(%arg0: i32, %arg1: memref<1xi32, #tpu.memory_space<smem>>) -> (i32, i32) {
    %c0 = arith.constant 0 : index
    %0 = memref.load %arg1[%c0] : memref<1xi32, #tpu.memory_space<smem>>
    %c0_i32 = arith.constant 0 : i32
    return %arg0, %0 : i32, i32
  }
  func.func @transform_3(%arg0: i32, %arg1: memref<1xi32, #tpu.memory_space<smem>>) -> (i32, i32) {
    %c0_i32 = arith.constant 0 : i32
    %c0_i32_0 = arith.constant 0 : i32
    return %arg0, %c0_i32 : i32, i32
  }
}

</mosaic_0001>

<bundles_post_ra>
// kernel: tpu_custom_call.1
= control target key start
LH: loop header
LB: loop body
LE: loop exit
PB: predicated region body
PF: predicated region fallthrough
CT: control target
= control target key end

     0   :  { %10 = vsyncpa [#allocation5], 0  ;;  %s277_s0 = inlined_call_operand.<no memory space> [shape: s32[1], index: 0, kind: input, shape index: {}]   ;;  %s278_s1 = inlined_call_operand.hbm [shape: f32[16,512], index: 1, kind: input, shape index: {}]   ;;  %s279_s2 = inlined_call_operand.hbm [shape: f32[16,512], index: 2, kind: input, shape index: {}]   ;;  %s280_s3 = inlined_call_operand.hbm [shape: f32[16,512], index: 3, kind: input, shape index: {}]   ;;  %s281_s4 = inlined_call_operand.vmem [shape: f32[16,1], index: 4, kind: output, shape index: {}]  }
   0x1   :  { %11 = vsyncpa [#allocation7], 0  ;;  %s108_s17 = sshll.u32 %s277_s0, 7  ;;  %s189_s21 = smov [#allocation6]  }
   0x2   :  { %s34_s20 = scalar_lea.hbm %s279_s2, %s108_s17  ;;  %s35_s22 = sshll.u32 %s189_s21, 4  ;;  %s36_s22 = int_to_ptr.vmem [resolvable:$true] %s35_s22 }
   0x3   :  { %s229_s25 = scalar_lea.hbm %s278_s1, %s108_s17  ;;  %s119_s26 = scalar_lea.hbm %s34_s20, 256 }
   0x4   :  { %p120_p0 = scmp.ne.s32.totalorder %s34_s20, %s119_s26  ;;  %s121_s29 = scalar_lea.hbm %s279_s2, 1024 }
   0x5   :  { %p122_p1 = scmp.lt.s32.totalorder %s34_s20, %s279_s2  ;;  %p123_p2 = scmp.lt.s32.totalorder %s121_s29, %s119_s26 }
   0x7   :  { %p124_p3 = por %p123_p2, %p122_p1 }
   0x9   :  { %p125_p4 = pnand %p124_p3, %p120_p0 }
   0xb   :  { %128 = shalt.err (!%p125_p4)
}
   0xc   :  { %s129_s5 = scalar_lea.vmem %s36_s22, 256  ;;  %p134_p6 = scmp.lt.s32.totalorder %s36_s22, %s36_s22 }
   0xd   :  { %p130_p5 = scmp.ne.s32.totalorder %s36_s22, %s129_s5  ;;  %p135_p7 = scmp.lt.s32.totalorder %s129_s5, %s129_s5 }
   0xf   :  { %p136_p8 = por %p135_p7, %p134_p6 }
  0x11   :  { %p137_p9 = pnand %p136_p8, %p130_p5 }
  0x13   :  { %140 = shalt.err (!%p137_p9)
}
  0x14   :  { %s190_s6 = smov 512   ;;  %s191_s7 = smov 128  }
  0x15   :  { %s192_s8 = smov 8   ;;  %s193_s2 = smov [#allocation4]  }
  0x16   :  { %41 = dma.hbm_to_vmem [thread:$0]  %s34_s20, 256, %s36_s22, [#allocation7], %s190_s6, %s191_s7, %s192_s8  }
  0x17   :  { %s20_s9 = sshll.u32 %s193_s2, 4  ;;  %s243_s12 = scalar_lea.hbm %s280_s3, %s108_s17  ;;  %s21_s9 = int_to_ptr.vmem [resolvable:$true] %s20_s9 }
  0x18   :  { %s141_s13 = scalar_lea.hbm %s229_s25, 256  ;;  %s143_s16 = scalar_lea.hbm %s278_s1, 1024 }
  0x19   :  { %p142_p10 = scmp.ne.s32.totalorder %s229_s25, %s141_s13  ;;  %p144_p11 = scmp.lt.s32.totalorder %s229_s25, %s278_s1 }
  0x1a   :  { %p145_p12 = scmp.lt.s32.totalorder %s143_s16, %s141_s13 }
  0x1c   :  { %p146_p13 = por %p145_p12, %p144_p11 }
  0x1e   :  { %p147_p0 = pnand %p146_p13, %p142_p10 }
  0x20   :  { %150 = shalt.err (!%p147_p0)
}
  0x21   :  { %s151_s20 = scalar_lea.vmem %s21_s9, 256  ;;  %p156_p2 = scmp.lt.s32.totalorder %s21_s9, %s21_s9 }
  0x22   :  { %p152_p1 = scmp.ne.s32.totalorder %s21_s9, %s151_s20  ;;  %p157_p3 = scmp.lt.s32.totalorder %s151_s20, %s151_s20 }
  0x24   :  { %p158_p4 = por %p157_p3, %p156_p2 }
  0x26   :  { %p159_p5 = pnand %p158_p4, %p152_p1 }
  0x28   :  { %162 = shalt.err (!%p159_p5)
}
  0x29   :  { %26 = dma.hbm_to_vmem [thread:$0]  %s229_s25, 256, %s21_s9, [#allocation5], %s190_s6, %s191_s7, %s192_s8  }
  0x2a   :  { %s194_s1 = smov [#allocation8]   ;;  %s163_s21 = scalar_lea.hbm %s243_s12, 256 }
  0x2b   :  { %s50_s17 = sshll.u32 %s194_s1, 4  ;;  %p164_p6 = scmp.ne.s32.totalorder %s243_s12, %s163_s21  ;;  %s51_s17 = int_to_ptr.vmem [resolvable:$true] %s50_s17 }
  0x2c   :  { %s165_s24 = scalar_lea.hbm %s280_s3, 1024  ;;  %p166_p7 = scmp.lt.s32.totalorder %s243_s12, %s280_s3 }
  0x2d   :  { %p167_p8 = scmp.lt.s32.totalorder %s165_s24, %s163_s21 }
  0x2f   :  { %p168_p9 = por %p167_p8, %p166_p7 }
  0x31   :  { %p169_p10 = pnand %p168_p9, %p164_p6 }
  0x33   :  { %172 = shalt.err (!%p169_p10)
}
  0x34   :  { %s173_s28 = scalar_lea.vmem %s51_s17, 256  ;;  %p178_p12 = scmp.lt.s32.totalorder %s51_s17, %s51_s17 }
  0x35   :  { %p174_p11 = scmp.ne.s32.totalorder %s51_s17, %s173_s28  ;;  %p179_p13 = scmp.lt.s32.totalorder %s173_s28, %s173_s28 }
  0x37   :  { %p180_p0 = por %p179_p13, %p178_p12 }
  0x39   :  { %p181_p1 = pnand %p180_p0, %p174_p11 }
  0x3b   :  { %184 = shalt.err (!%p181_p1)
}
  0x3c   :  { %56 = dma.hbm_to_vmem [thread:$0]  %s243_s12, 256, %s51_s17, [#allocation7], %s190_s6, %s191_s7, %s192_s8  }
  0x3d   :  { %185 = dma.done.wait [#allocation5], 256  }
  0x3e   :  { %186 = vsyncadd [#allocation5], 4294967040 }
  0x3f   :  { %187 = dma.done.wait [#allocation7], 512  }
  0x40   :  { %188 = vsyncadd [#allocation7], 4294966784  ;;  %v69_v0 = vld [vmem:[#allocation4] sm:$0xff]  ;;  %v71_v1 = vld [vmem:[#allocation6] sm:$0xff]  ;;  %vm93_vm0 = vcmask 7168  }
  0x41   :  { %v73_v2 = vld [vmem:[#allocation8] sm:$0xff]  ;;  %v111_v3 = vadd.f32 -1.0, %v69_v0  ;;  %v81_v4 = vmax.f32 %v71_v1, 0.0  ;;  %v70_v5 = vld [vmem:[#allocation4 + $0x8] sm:$0xff]  ;;  %v72_v6 = vld [vmem:[#allocation6 + $0x8] sm:$0xff] }
  0x42   :  { %v74_v7 = vld [vmem:[#allocation8 + $0x8] sm:$0xff]  ;;  %v112_v8 = vadd.f32 -1.0, %v70_v5  ;;  %v82_v9 = vmax.f32 %v72_v6, 0.0 }
  0x43   :  { %v77_v10 = vmax.f32 %v111_v3, 0.0  ;;  %v83_v11 = vmul.f32 %v81_v4, %v73_v2 }
  0x44   :  { %v78_v12 = vmax.f32 %v112_v8, 0.0  ;;  %v84_v13 = vmul.f32 %v82_v9, %v74_v7 }
  0x45   :  { %v79_v14 = vmul.f32 %v77_v10, %v73_v2 }
  0x46   :  { %v80_v15 = vmul.f32 %v78_v12, %v74_v7 }
  0x47   :  { %v85_v16 = vsub.f32 %v79_v14, %v83_v11 }
  0x48   :  { %v86_v17 = vsub.f32 %v80_v15, %v84_v13 }
  0x49   :  { %v87_v18 = vmax.f32 %v85_v16, 0.0 }
  0x4a   :  { %v88_v19 = vmax.f32 %v86_v17, 0.0 }
  0x4b   :  { %89 = vadd.xlane.f32.xlu0 %v87_v18 }
  0x4f   :  { %91 = vadd.xlane.f32.xlu0 %v88_v19 }
  0xd4   :  { %v90_v20 = vpop.xlane.xlu0 %89 }
  0xd5   :  { %94 = vst.msk [vmem:[%s281_s4] sm:$0xff] %vm93_vm0, %v90_v20 }
  0xd8   :  { %v92_v21 = vpop.xlane.xlu0 %91 }
  0xd9   :  { %95 = vst.msk [vmem:[%s281_s4 + $0x8] sm:$0xff] %vm93_vm0, %v92_v21 }
  0xda   :  { %100 = vsyncpa [#allocation5], 1 }
  0xdb   :  { %101 = vsyncpa [#allocation7], 1 }

</bundles_post_ra>
